<compile_context>
chip_gen: v6e
topology: v6e:2x2x1
jax: 0.10.0
libtpu: 0.0.40
codegen_flags: <defaults>
</compile_context>

<pallas_src>
import functools
import math

import jax
import jax.numpy as jnp
from jax.experimental import pallas as pl
from jax.experimental.pallas import tpu as pltpu


# --------------------------------------------------------------------------
# helpers
# --------------------------------------------------------------------------
def _round_down(v, m):
    return (v // m) * m


def _round_up(v, m):
    return ((v + m - 1) // m) * m


def _vmem_budgets():
    """Per-generation VMEM sizing (v5e/v6e: 128 MiB, v7x: 64 MiB per core)."""
    try:
        cap = int(pltpu.get_tpu_info().vmem_capacity_bytes)
    except Exception:
        cap = 64 * 1024 * 1024                      # conservative (v7x-sized)
    limit = min(int(cap * 0.60), cap - (16 << 20))  # scoped VMEM request
    if limit <= 0:
        limit = int(cap * 0.5)
    tile_budget = int(limit * 0.60)                 # budget for tiles + temps
    return tile_budget, limit


def _per_lane_bytes(cin, c4):
    # double-buffered x tile (2*Cin) + double-buffered out tile (2*C4)
    # + f32 accumulator (C4) + one rearranged temporary (C4), 4 B each.
    return 4 * (2 * cin + 4 * c4)


def _weight_bytes(cin, c4):
    # double-buffered resident weight + bias blocks
    return 2 * (c4 * cin + c4) * 4


def _prep_weights(weight, bias):
    cin, cout = weight.shape[0], weight.shape[1]
    c4 = 4 * cout
    # (Cin, Cout, 2, 2) -> (Cout, 2, 2, Cin) -> (4*Cout, Cin); row q = co*4 + ki*2 + kj
    w_mat = jnp.transpose(weight, (1, 2, 3, 0)).reshape(c4, cin)
    b_mat = jnp.repeat(bias, 4).reshape(c4, 1)
    return w_mat, b_mat


# --------------------------------------------------------------------------
# fused kernel: writes the shuffled (N, Cout, 2H, 2W) layout directly
# --------------------------------------------------------------------------
def _fused_kernel(cout, tr, w, x_ref, w_ref, b_ref, o_ref):
    # x_ref: (1, Cin, tr*W)  w_ref: (4*Cout, Cin)  b_ref: (4*Cout, 1)
    # o_ref: (1, Cout, 4*tr*W)  -- flat rows of the final (2H, 2W) image
    acc = jnp.dot(w_ref[...], x_ref[0], preferred_element_type=jnp.float32)
    acc = acc + b_ref[...]                         # (4*Cout, tr*W)
    # rows q = co*4 + ki*2 + kj ; lanes p = ti*W + j
    t = acc.reshape(cout, 2, 2, tr, w)             # (co, ki, kj, ti, j)
    t = jnp.transpose(t, (0, 3, 1, 4, 2))          # (co, ti, ki, j, kj)
    # flat lane index = ti*4W + ki*2W + 2j + kj == row-major (2H, 2W) offset
    o_ref[0] = t.reshape(cout, 4 * tr * w).astype(o_ref.dtype)


def _choose_row_tile(n, h, w, cin, c4, tile_budget):
    """Pick an input-row tile tr so the x block is (Cin, tr*W)."""
    per_row = _per_lane_bytes(cin, c4) * w
    budget_rows = tile_budget // max(per_row, 1)
    step = 128 // math.gcd(w, 128)     # tr granularity for (tr*W) % 128 == 0
    pref = 512 // math.gcd(w, 512)     # granularity for (tr*W) % 512 == 0
    if budget_rows >= h:
        tr = h                          # full rows always form a legal block
    else:
        tr = 0
        for m in (pref, step):
            t = _round_down(budget_rows, m)
            if t >= m:
                tr = t
                break
        if tr == 0:
            tr = h                      # cannot align a partial tile
    # v7x megacore: make a single-image call still yield >= 2 grid blocks.
    if n == 1 and tr >= h and h > 1:
        for m in (pref, step):
            t = _round_down(pl.cdiv(h, 2), m)
            if 0 < t < h:
                tr = t
                break
    return min(tr, h)


@jax.jit
def _transition_up_fused(x, weight, bias):
    n, cin, h, w = x.shape
    cout = weight.shape[1]
    c4 = 4 * cout
    hw = h * w

    tile_budget, vmem_limit = _vmem_budgets()
    tile_budget = max(tile_budget - _weight_bytes(cin, c4), 2 << 20)
    tr = _choose_row_tile(n, h, w, cin, c4, tile_budget)
    tp = tr * w

    x3 = x.reshape(n, cin, hw)                     # contiguous, free
    w_mat, b_mat = _prep_weights(weight, bias)

    y_flat = pl.pallas_call(
        functools.partial(_fused_kernel, cout, tr, w),
        out_shape=jax.ShapeDtypeStruct((n, cout, 4 * hw), x.dtype),
        grid_spec=pltpu.PrefetchScalarGridSpec(
            num_scalar_prefetch=0,
            grid=(n, pl.cdiv(h, tr)),
            in_specs=[
                pl.BlockSpec((1, cin, tp), lambda b, r: (b, 0, r)),   # x rows
                pl.BlockSpec((c4, cin), lambda b, r: (0, 0)),         # weight
                pl.BlockSpec((c4, 1), lambda b, r: (0, 0)),           # bias
            ],
            out_specs=pl.BlockSpec((1, cout, 4 * tp), lambda b, r: (b, 0, r)),
        ),
        compiler_params=pltpu.CompilerParams(
            dimension_semantics=("parallel", "parallel"),
            vmem_limit_bytes=vmem_limit,
        ),
    )(x3, w_mat, b_mat)

    # (H, 2, W, 2) row-major == (2H, 2W) row-major: this reshape is a free view.
    return y_flat.reshape(n, cout, 2 * h, 2 * w)


# --------------------------------------------------------------------------
# fallback kernel (proven): matmul kernel + XLA pixel shuffle
# --------------------------------------------------------------------------
def _unfused_kernel(x_ref, w_ref, b_ref, o_ref):
    # x_ref: (1, Cin, tp)  w_ref: (4*Cout, Cin)  b_ref: (4*Cout, 1)
    acc = jnp.dot(w_ref[...], x_ref[0], preferred_element_type=jnp.float32)
    o_ref[0] = (acc + b_ref[...]).astype(o_ref.dtype)


def _choose_pixel_tile(n, hw, cin, c4, tile_budget):
    cap = _round_down(tile_budget // _per_lane_bytes(cin, c4), 512)
    cap = max(cap, 128)
    tp = hw if hw <= cap else cap
    if n == 1 and tp >= hw and hw > 512:            # >= 2 blocks for v7x megacore
        tp = max(512, _round_up(pl.cdiv(hw, 2), 512))
    return tp


@jax.jit
def _transition_up_unfused(x, weight, bias):
    n, cin, h, w = x.shape
    cout = weight.shape[1]
    c4 = 4 * cout
    hw = h * w

    tile_budget, vmem_limit = _vmem_budgets()
    tile_budget = max(tile_budget - _weight_bytes(cin, c4), 2 << 20)
    tp = _choose_pixel_tile(n, hw, cin, c4, tile_budget)

    x3 = x.reshape(n, cin, hw)
    w_mat, b_mat = _prep_weights(weight, bias)

    y = pl.pallas_call(
        _unfused_kernel,
        out_shape=jax.ShapeDtypeStruct((n, c4, hw), x.dtype),
        grid_spec=pltpu.PrefetchScalarGridSpec(
            num_scalar_prefetch=0,
            grid=(n, pl.cdiv(hw, tp)),               # ragged edge: masked stores
            in_specs=[
                pl.BlockSpec((1, cin, tp), lambda b, p: (b, 0, p)),
                pl.BlockSpec((c4, cin), lambda b, p: (0, 0)),
                pl.BlockSpec((c4, 1), lambda b, p: (0, 0)),
            ],
            out_specs=pl.BlockSpec((1, c4, tp), lambda b, p: (b, 0, p)),
        ),
        compiler_params=pltpu.CompilerParams(
            dimension_semantics=("parallel", "parallel"),
            vmem_limit_bytes=vmem_limit,
        ),
    )(x3, w_mat, b_mat)

    # Pixel shuffle in XLA (fallback path only).
    y = y.reshape(n, cout, 2, 2, h, w)
    y = jnp.transpose(y, (0, 1, 4, 2, 5, 3)).reshape(n, cout, 2 * h, 2 * w)
    return y


# --------------------------------------------------------------------------
# dispatcher: probe the fused path once, fall back if it cannot lower/verify
# --------------------------------------------------------------------------
def _reference(x, weight, bias):
    """Pure-JAX reference of ConvTranspose2d(k=2, s=2)."""
    n, cin, h, w = x.shape
    cout = weight.shape[1]
    r = jnp.einsum("ncij,cdkl->ndikjl", x, weight)   # (N, Cout, H, 2, W, 2)
    r = r.reshape(n, cout, 2 * h, 2 * w)
    return r + bias[None, :, None, None]


_FUSED_OK = None   # resolved on the first call


def transition_up(x, weight, bias):
    """ConvTranspose2d(kernel_size=2, stride=2) forward, PyTorch semantics.

    x: (N, Cin, H, W) f32, weight: (Cin, Cout, 2, 2) f32, bias: (Cout,) f32
    returns (N, Cout, 2H, 2W) f32.
    """
    global _FUSED_OK
    if _FUSED_OK is None:
        try:
            y = jax.block_until_ready(_transition_up_fused(x, weight, bias))
            ref = _reference(x, weight, bias)
            _FUSED_OK = bool(jnp.allclose(y, ref, atol=1e-2, rtol=1e-2))
            if _FUSED_OK:
                return y
        except Exception:
            _FUSED_OK = False
    if _FUSED_OK:
        return _transition_up_fused(x, weight, bias)
    return _transition_up_unfused(x, weight, bias)


# --------------------------------------------------------------------------
if __name__ == "__main__":
    key = jax.random.PRNGKey(0)
    k_x, k_w, k_b = jax.random.split(key, 3)

    N, Cin, Cout, H, W = 2, 4, 8, 16, 16
    x = jax.random.normal(k_x, (N, Cin, H, W), dtype=jnp.float32)
    weight = jax.random.normal(k_w, (Cin, Cout, 2, 2), dtype=jnp.float32) * 0.1
    bias = jax.random.normal(k_b, (Cout,), dtype=jnp.float32) * 0.1

    out = jax.block_until_ready(transition_up(x, weight, bias))
    ref = _reference(x, weight, bias)

    assert out.shape == (N, Cout, 2 * H, 2 * W), out.shape
    max_err = float(jnp.max(jnp.abs(out - ref)))
    # Tolerance accounts for MXU matmul precision vs. the XLA einsum reference.
    assert jnp.allclose(out, ref, atol=1e-2, rtol=1e-2), max_err
    print("KERNEL_OK")
</pallas_src>

<mosaic_0001>
module attributes {stable_mosaic.version = 11 : i64} {
  func.func @_fused_kernel(%arg0: i32, %arg1: i32, %arg2: memref<1x4x256xf32, #tpu.memory_space<vmem>>, %arg3: memref<32x4xf32, #tpu.memory_space<vmem>>, %arg4: memref<32x1xf32, #tpu.memory_space<vmem>>, %arg5: memref<1x8x1024xf32, #tpu.memory_space<vmem>>) attributes {dimension_semantics = [#tpu.dimension_semantics<parallel>, #tpu.dimension_semantics<parallel>], iteration_bounds = array<i64: 2, 1>, scalar_prefetch = 0 : i64, scratch_operands = 0 : i64, tpu.core_type = #tpu.core_type<tc>, window_params = [{transform_indices = @transform_0, window_bounds = array<i64: 1, 4, 256>}, {pipeline_mode = #tpu.pipeline_mode<synchronous>, transform_indices = @transform_1, window_bounds = array<i64: 32, 4>}, {pipeline_mode = #tpu.pipeline_mode<synchronous>, transform_indices = @transform_2, window_bounds = array<i64: 32, 1>}, {transform_indices = @transform_3, window_bounds = array<i64: 1, 8, 1024>}]} {
    %c0 = arith.constant 0 : index
    %c0_0 = arith.constant 0 : index
    %0 = vector.load %arg3[%c0, %c0_0] : memref<32x4xf32, #tpu.memory_space<vmem>>, vector<32x4xf32>
    %c0_1 = arith.constant 0 : index
    %c0_2 = arith.constant 0 : index
    %c0_3 = arith.constant 0 : index
    %1 = vector.load %arg2[%c0_1, %c0_2, %c0_3] : memref<1x4x256xf32, #tpu.memory_space<vmem>>, vector<1x4x256xf32>
    %2 = vector.shape_cast %1 : vector<1x4x256xf32> to vector<4x256xf32>
    %cst = arith.constant dense<0.000000e+00> : vector<32x256xf32>
    %3 = tpu.matmul %0, %2, %cst {dimension_numbers = #tpu.dot_dimension_numbers<[1], [0], [0], [1], [0, 0, 1, 1], [], []>} : vector<32x4xf32>, vector<4x256xf32>, vector<32x256xf32> -> vector<32x256xf32>
    %c0_4 = arith.constant 0 : index
    %c0_5 = arith.constant 0 : index
    %4 = vector.load %arg4[%c0_4, %c0_5] : memref<32x1xf32, #tpu.memory_space<vmem>>, vector<32x1xf32>
    %5 = vector.broadcast %4 : vector<32x1xf32> to vector<32x256xf32>
    %6 = arith.addf %3, %5 : vector<32x256xf32>
    %7 = vector.shape_cast %6 : vector<32x256xf32> to vector<8x2x2x16x16xf32>
    %8 = tpu.transpose %7, [0, 3, 1, 4, 2] : vector<8x2x2x16x16xf32> -> vector<8x16x2x16x2xf32>
    %9 = vector.shape_cast %8 : vector<8x16x2x16x2xf32> to vector<8x1024xf32>
    %c0_6 = arith.constant 0 : index
    %c0_7 = arith.constant 0 : index
    %c0_8 = arith.constant 0 : index
    %10 = vector.load %arg5[%c0_6, %c0_7, %c0_8] : memref<1x8x1024xf32, #tpu.memory_space<vmem>>, vector<1x8x1024xf32>
    %11 = vector.shape_cast %10 : vector<1x8x1024xf32> to vector<8x1024xf32>
    %12 = vector.shape_cast %9 : vector<8x1024xf32> to vector<1x8x1024xf32>
    tpu.vector_store %arg5[%c0_6, %c0_7, %c0_8], %12 {strides = array<i32>} : memref<1x8x1024xf32, #tpu.memory_space<vmem>>, vector<1x8x1024xf32>,
    return
  }
  func.func @transform_0(%arg0: i32, %arg1: i32) -> (i32, i32, i32) {
    %c0_i32 = arith.constant 0 : i32
    %c0_i32_0 = arith.constant 0 : i32
    return %arg0, %c0_i32, %arg1 : i32, i32, i32
  }
  func.func @transform_1(%arg0: i32, %arg1: i32) -> (i32, i32) {
    %c0_i32 = arith.constant 0 : i32
    %c0_i32_0 = arith.constant 0 : i32
    %c0_i32_1 = arith.constant 0 : i32
    return %c0_i32, %c0_i32_0 : i32, i32
  }
  func.func @transform_2(%arg0: i32, %arg1: i32) -> (i32, i32) {
    %c0_i32 = arith.constant 0 : i32
    %c0_i32_0 = arith.constant 0 : i32
    %c0_i32_1 = arith.constant 0 : i32
    return %c0_i32, %c0_i32_0 : i32, i32
  }
  func.func @transform_3(%arg0: i32, %arg1: i32) -> (i32, i32, i32) {
    %c0_i32 = arith.constant 0 : i32
    %c0_i32_0 = arith.constant 0 : i32
    return %arg0, %c0_i32, %arg1 : i32, i32, i32
  }
}

module attributes {stable_mosaic.version = 11 : i64} {
  func.func @_unfused_kernel(%arg0: i32, %arg1: i32, %arg2: memref<1x4x256xf32, #tpu.memory_space<vmem>>, %arg3: memref<32x4xf32, #tpu.memory_space<vmem>>, %arg4: memref<32x1xf32, #tpu.memory_space<vmem>>, %arg5: memref<1x32x256xf32, #tpu.memory_space<vmem>>) attributes {dimension_semantics = [#tpu.dimension_semantics<parallel>, #tpu.dimension_semantics<parallel>], iteration_bounds = array<i64: 2, 1>, scalar_prefetch = 0 : i64, scratch_operands = 0 : i64, tpu.core_type = #tpu.core_type<tc>, window_params = [{transform_indices = @transform_0, window_bounds = array<i64: 1, 4, 256>}, {pipeline_mode = #tpu.pipeline_mode<synchronous>, transform_indices = @transform_1, window_bounds = array<i64: 32, 4>}, {pipeline_mode = #tpu.pipeline_mode<synchronous>, transform_indices = @transform_2, window_bounds = array<i64: 32, 1>}, {transform_indices = @transform_3, window_bounds = array<i64: 1, 32, 256>}]} {
    %c0 = arith.constant 0 : index
    %c0_0 = arith.constant 0 : index
    %0 = vector.load %arg3[%c0, %c0_0] : memref<32x4xf32, #tpu.memory_space<vmem>>, vector<32x4xf32>
    %c0_1 = arith.constant 0 : index
    %c0_2 = arith.constant 0 : index
    %c0_3 = arith.constant 0 : index
    %1 = vector.load %arg2[%c0_1, %c0_2, %c0_3] : memref<1x4x256xf32, #tpu.memory_space<vmem>>, vector<1x4x256xf32>
    %2 = vector.shape_cast %1 : vector<1x4x256xf32> to vector<4x256xf32>
    %cst = arith.constant dense<0.000000e+00> : vector<32x256xf32>
    %3 = tpu.matmul %0, %2, %cst {dimension_numbers = #tpu.dot_dimension_numbers<[1], [0], [0], [1], [0, 0, 1, 1], [], []>} : vector<32x4xf32>, vector<4x256xf32>, vector<32x256xf32> -> vector<32x256xf32>
    %c0_4 = arith.constant 0 : index
    %c0_5 = arith.constant 0 : index
    %4 = vector.load %arg4[%c0_4, %c0_5] : memref<32x1xf32, #tpu.memory_space<vmem>>, vector<32x1xf32>
    %5 = vector.broadcast %4 : vector<32x1xf32> to vector<32x256xf32>
    %6 = arith.addf %3, %5 : vector<32x256xf32>
    %c0_6 = arith.constant 0 : index
    %c0_7 = arith.constant 0 : index
    %c0_8 = arith.constant 0 : index
    %7 = vector.load %arg5[%c0_6, %c0_7, %c0_8] : memref<1x32x256xf32, #tpu.memory_space<vmem>>, vector<1x32x256xf32>
    %8 = vector.shape_cast %7 : vector<1x32x256xf32> to vector<32x256xf32>
    %9 = vector.shape_cast %6 : vector<32x256xf32> to vector<1x32x256xf32>
    tpu.vector_store %arg5[%c0_6, %c0_7, %c0_8], %9 {strides = array<i32>} : memref<1x32x256xf32, #tpu.memory_space<vmem>>, vector<1x32x256xf32>,
    return
  }
  func.func @transform_0(%arg0: i32, %arg1: i32) -> (i32, i32, i32) {
    %c0_i32 = arith.constant 0 : i32
    %c0_i32_0 = arith.constant 0 : i32
    return %arg0, %c0_i32, %arg1 : i32, i32, i32
  }
  func.func @transform_1(%arg0: i32, %arg1: i32) -> (i32, i32) {
    %c0_i32 = arith.constant 0 : i32
    %c0_i32_0 = arith.constant 0 : i32
    %c0_i32_1 = arith.constant 0 : i32
    return %c0_i32, %c0_i32_0 : i32, i32
  }
  func.func @transform_2(%arg0: i32, %arg1: i32) -> (i32, i32) {
    %c0_i32 = arith.constant 0 : i32
    %c0_i32_0 = arith.constant 0 : i32
    %c0_i32_1 = arith.constant 0 : i32
    return %c0_i32, %c0_i32_0 : i32, i32
  }
  func.func @transform_3(%arg0: i32, %arg1: i32) -> (i32, i32, i32) {
    %c0_i32 = arith.constant 0 : i32
    %c0_i32_0 = arith.constant 0 : i32
    return %arg0, %c0_i32, %arg1 : i32, i32, i32
  }
}

</mosaic_0001>

<bundles_post_ra>
// kernel: _transition_up_unfused.1
= control target key start
LH: loop header
LB: loop body
LE: loop exit
PB: predicated region body
PF: predicated region fallthrough
CT: control target
= control target key end

     0   :  { %s539_s12 = smov 0   ;;  %s541_s13 = smov 0   ;;  %s600_s0 = inlined_call_operand.vmem [shape: f32[2,4,256], index: 0, kind: input, shape index: {}]   ;;  %s601_s1 = inlined_call_operand.vmem [shape: f32[32,4], index: 1, kind: input, shape index: {}]   ;;  %s602_s2 = inlined_call_operand.vmem [shape: f32[32,1], index: 2, kind: input, shape index: {}]   ;;  %s603_s3 = inlined_call_operand.vmem [shape: f32[2,32,256], index: 3, kind: output, shape index: {}]  }
   0x1   :  { %s543_s14 = smov 0  }
   0x2 LB: > { %s25_s15 = sadd.s32 1, %s511_s13  ;;  %p447_p0 = scmp.ge.s32.totalorder %s515_s14, 1  ;;  %s515_s14 = sphi %s543_s14, %s13_s14   ;;  %s511_s13 = sphi %s541_s13, %s605_s13   ;;  %s507_s12 = sphi %s539_s12, %s604_s12  }
   0x3   : > { %p27_p1 = scmp.ge.s32.totalorder %s25_s15, 2  ;;  %p158_p2 = scmp.lt.s32.totalorder %s515_s14, 3 }
   0x5   : > { %s607_s15 = smov (%p27_p1, %s25_s15), 0  ;;  %p159_p3 = pnand %p447_p0, %p158_p2 }
   0x6   : > { %p191_p4 = scmp.lt.s32.totalorder (!%p159_p3), %s507_s12, 1 }
   0x7   : > { %162 = sbr.rel (%p159_p3) target bundleno = 223 (0xdf), region = 32 }
   0xc   : > { %v517_v0 = vmov 0.0   ;;  %v217_v1 = vld [vmem:[%s602_s2 + $0x10] sm:$0xff]  ;;  %s609_s12 = smov (!%p191_p4, %s507_s12), 1  ;;  %v518_v2 = vmov 0   ;;  %v215_v3 = vld [vmem:[%s602_s2] sm:$0xff]  ;;  %v218_v4 = vld [vmem:[%s602_s2 + $0x18] sm:$0xff] }
   0xd   : > { %323 = vmatprep.mubr.f32.mxu0 %v517_v0  ;;  %335 = vmatprep.mubr.f32.mxu1 %v517_v0  ;;  %s460_s20 = sshll.u32 %s609_s12, 3  ;;  %v216_v5 = vld [vmem:[%s602_s2 + $0x8] sm:$0xff]  ;;  %vm254_vm0 = vcmask 1043456   ;;  %v210_v8 = vld [vmem:[%s601_s1] sm:$0xff]  ;;  %vm241_vm1 = vcmask 31744   ;;  %v212_v9 = vld [vmem:[%s601_s1 + $0x10] sm:$0xff] }
   0xe   : > { %491 = vset.pattern.permute.xlu1 %v518_v2  ;;  %490 = vset.pattern.permute.xlu0 %v518_v2  ;;  %s198_s27 = scalar_lea.vmem %s600_s0, %s460_s20  ;;  %v211_v10 = vld [vmem:[%s601_s1 + $0x8] sm:$0xff]  ;;  %v213_v11 = vld [vmem:[%s601_s1 + $0x18] sm:$0xff]  ;;  %s461_s9 = sshll.u32 %s609_s12, 6 }
   0xf   : > { %231 = vperm.xlu1 %491, %v217_v1   ;;  %221 = vperm.xlu0 %490, %v215_v3   ;;  %v214_v6 = vld [vmem:[%s198_s27] sm:$0xff]  ;;  %s208_s16 = scalar_lea.vmem %s603_s3, %s461_s9 }
  0x10   : > { %v240_v7 = vcombine.high %v214_v6, %v214_v6 }
  0x12   : > { %452 = vmatprep.subr.msk.mxu0 %vm254_vm0, %v240_v7  ;;  %462 = vmatprep.subr.msk.mxu1 %vm254_vm0, %v240_v7 }
  0x13   : > { %236 = vperm.xlu1 %491, %v218_v4   ;;  %226 = vperm.xlu0 %490, %v216_v5  }
  0x14   : > { %453 = vmatpush1.msk.msra.mxu0 %vm254_vm0, %v214_v6  ;;  %463 = vmatpush1.msk.msra.mxu1 %vm254_vm0, %v214_v6 }
  0x15   : > { %454 = vmatmul.mubr.msk.f32.vlgmr.msra.gmra.mxu0 %vm241_vm1, %v210_v8  ;;  %456 = vmatmul.mubr.msk.f32.vlgmr.msra.gmra.mxu1 %vm241_vm1, %v212_v9 }
  0x16   : > { %329 = vmatprep.mubr.f32.mxu0 %v517_v0  ;;  %341 = vmatprep.mubr.f32.mxu1 %v517_v0 }
  0x19   : > { %455 = vmatmul.mubr.msk.f32.gmra.mxu0 %vm241_vm1, %v211_v10  ;;  %457 = vmatmul.mubr.msk.f32.gmra.mxu1 %vm241_vm1, %v213_v11 }
  0x8a   : > { %v232_v12 = vpop.permute.xlu1 %231  ;;  %v222_v13 = vpop.permute.xlu0 %221 }
  0x8e   : > { %v237_v20 = vpop.permute.xlu1 %236  ;;  %v227_v21 = vpop.permute.xlu0 %226 }
  0xd5   : > { %v325_v14 = vpop.f32.mrf.mxu0  ;;  %v337_v15 = vpop.f32.mrf.mxu1 }
  0xd6   : > { %v326_v16 = vadd.f32 %v325_v14, %v222_v13  ;;  %v338_v17 = vadd.f32 %v337_v15, %v232_v12 }
  0xd7   : > { %v327_v18 = vpop.f32.mrf.mxu0  ;;  %v339_v19 = vpop.f32.mrf.mxu1 }
  0xd8   : > { %348 = vst [vmem:[%s208_s16] sm:$0xff] %v326_v16  ;;  %352 = vst [vmem:[%s208_s16 + $0x20] sm:$0xff] %v338_v17  ;;  %v328_v22 = vadd.f32 %v327_v18, %v222_v13  ;;  %v340_v23 = vadd.f32 %v339_v19, %v232_v12 }
  0xd9   : > { %v331_v24 = vpop.f32.mrf.mxu0  ;;  %v343_v25 = vpop.f32.mrf.mxu1 }
  0xda   : > { %349 = vst [vmem:[%s208_s16 + $0x8] sm:$0xff] %v328_v22  ;;  %353 = vst [vmem:[%s208_s16 + $0x28] sm:$0xff] %v340_v23  ;;  %v332_v26 = vadd.f32 %v331_v24, %v227_v21  ;;  %v344_v27 = vadd.f32 %v343_v25, %v237_v20 }
  0xdb   : > { %v333_v28 = vpop.f32.mrf.mxu0  ;;  %v345_v29 = vpop.f32.mrf.mxu1 }
  0xdc   : > { %350 = vst [vmem:[%s208_s16 + $0x10] sm:$0xff] %v332_v26  ;;  %354 = vst [vmem:[%s208_s16 + $0x30] sm:$0xff] %v344_v27  ;;  %v334_v30 = vadd.f32 %v333_v28, %v227_v21  ;;  %v346_v31 = vadd.f32 %v345_v29, %v237_v20 }
  0xde   : > { %351 = vst [vmem:[%s208_s16 + $0x18] sm:$0xff] %v334_v30  ;;  %355 = vst [vmem:[%s208_s16 + $0x38] sm:$0xff] %v346_v31 }
  0xdf PF: > { %s13_s14 = sadd.s32 1, %s515_s14   ;;  %s604_s12 = smov %s511_s13 }
  0xe0   : > { %p10_p5 = scmp.ge.s32.totalorder %s13_s14, 4   ;;  %s605_s13 = smov %s607_s15 }
  0xe2   :  { %12 = sbr.rel (!%p10_p5) target bundleno = 2 (0x2), region = 62 }

</bundles_post_ra>
